<compile_context>
chip_gen: v7x
topology: tpu7x:2x2x1
jax: 0.10.0
libtpu: 0.0.40
codegen_flags: <defaults>
</compile_context>

<pallas_src>
import jax
import jax.numpy as jnp
from jax.experimental import pallas as pl
from jax.experimental.pallas import tpu as pltpu

_LANES = 128
_HIDDEN = 10


def _round_up(v, m):
    return ((v + m - 1) // m) * m


def _make_mlp_kernel(compute_dtype):
    def _mlp_kernel(x_ref, w1_ref, b1_ref, w2_ref, b2_ref, o_ref):
        # x_ref/o_ref: (br, 128) f32 tiles in VMEM (lane-dense batch slab).
        # w1/b1/w2: (10,) f32 in SMEM; b2: (1,) f32 in SMEM.
        x = x_ref[...]
        xc = x.astype(compute_dtype)               # no-op when compute_dtype==f32
        acc = jnp.full_like(x, -b2_ref[0])         # negated fc2 bias (f32 acc)
        for j in range(_HIDDEN):                   # fully unrolled at trace time
            w1j = w1_ref[j].astype(compute_dtype)
            b1j = b1_ref[j].astype(compute_dtype)
            h = jnp.maximum(xc * w1j + b1j, 0.0)                 # fc1 + ReLU (VPU)
            acc = acc - h.astype(jnp.float32) * w2_ref[j]        # acc = -(fc2 logit)
        # sigmoid(y) = 1/(1+exp(-y)) with acc = -y; clamp so exp never overflows
        # before the approximate EUP reciprocal.
        acc = jnp.minimum(acc, 30.0)
        o_ref[...] = pl.reciprocal(1.0 + jnp.exp(acc), approx=True).astype(o_ref.dtype)

    return _mlp_kernel


def simple_classifier(x, w1, b1, w2, b2, *, block_rows=4096,
                      compute_dtype=jnp.float32):
    """x: (B, 1) f32. w1, b1, w2: (10,) f32; b2: (1,) f32. Returns (B, 1) f32."""
    B = x.shape[0]
    block_rows = max(8, _round_up(block_rows, 8))

    # Lane-dense layout sized to the data: rows = cdiv(B, 128); pad only the
    # <=127-element tail, and only when needed (zero-copy when B % 128 == 0).
    rows = pl.cdiv(B, _LANES)
    n_pad = rows * _LANES - B
    x_flat = x.reshape(-1).astype(jnp.float32)
    if n_pad:
        x_flat = jnp.pad(x_flat, (0, n_pad))
    x2d = x_flat.reshape(rows, _LANES)

    # Block rows: multiple of 8, <= block_rows, aiming for ~4 grid steps so the
    # "parallel" axis can be sharded across v7x's two TensorCores.  Pallas
    # handles a partial final block; a single full-array block is used when the
    # slab is smaller than one block (block shape == full array dims is legal).
    br = min(block_rows, _round_up(pl.cdiv(rows, 4), 8))
    if br >= rows:
        br = rows
    grid = pl.cdiv(rows, br)

    n_elems = rows * _LANES
    cost = pl.CostEstimate(flops=52 * n_elems, transcendentals=2 * n_elems,
                           bytes_accessed=8 * n_elems)

    smem = lambda: pl.BlockSpec(memory_space=pltpu.MemorySpace.SMEM)

    out2d = pl.pallas_call(
        _make_mlp_kernel(compute_dtype),
        out_shape=jax.ShapeDtypeStruct((rows, _LANES), jnp.float32),
        grid=(grid,),
        in_specs=[
            pl.BlockSpec((br, _LANES), lambda i: (i, 0)),  # x tile
            smem(),  # w1
            smem(),  # b1
            smem(),  # w2
            smem(),  # b2
        ],
        out_specs=pl.BlockSpec((br, _LANES), lambda i: (i, 0)),
        compiler_params=pltpu.CompilerParams(
            dimension_semantics=("parallel",),
        ),
        cost_estimate=cost,
    )(x2d, w1.reshape(-1), b1.reshape(-1), w2.reshape(-1), b2.reshape(-1))

    out_flat = out2d.reshape(-1)
    if n_pad:
        out_flat = out_flat[:B]   # drop padded tail only when padding was added
    return out_flat.reshape(B, 1)


def _ref_forward(x, w1, b1, w2, b2):
    h = jnp.maximum(x @ w1.reshape(1, -1) + b1.reshape(1, -1), 0.0)
    return jax.nn.sigmoid(h @ w2.reshape(-1, 1) + b2.reshape(1, 1))


if __name__ == "__main__":
    key = jax.random.PRNGKey(0)
    k_x, k_w1, k_b1, k_w2, k_b2, k_x2, k_x3 = jax.random.split(key, 7)

    # nn.Linear(1, 10) / nn.Linear(10, 1) parameters, stored as flat vectors.
    w1 = jax.random.normal(k_w1, (_HIDDEN,), dtype=jnp.float32) * 0.5
    b1 = jax.random.normal(k_b1, (_HIDDEN,), dtype=jnp.float32) * 0.1
    w2 = jax.random.normal(k_w2, (_HIDDEN,), dtype=jnp.float32) * 0.5
    b2 = jax.random.normal(k_b2, (1,), dtype=jnp.float32) * 0.1

    # Small demo batch (as in the module spec) ...
    B = 8
    x = jax.random.normal(k_x, (B, 1), dtype=jnp.float32)
    out = jax.block_until_ready(simple_classifier(x, w1, b1, w2, b2))
    ref = _ref_forward(x, w1, b1, w2, b2)
    assert out.shape == (B, 1)
    assert jnp.allclose(out, ref, atol=2e-3, rtol=2e-3), (out, ref)

    # ... a non-multiple-of-128 batch to exercise the tail-padding path ...
    B2 = 300
    x2 = jax.random.normal(k_x2, (B2, 1), dtype=jnp.float32)
    out2 = jax.block_until_ready(simple_classifier(x2, w1, b1, w2, b2))
    ref2 = _ref_forward(x2, w1, b1, w2, b2)
    assert out2.shape == (B2, 1)
    assert jnp.allclose(out2, ref2, atol=2e-3, rtol=2e-3)

    # ... and a multiple-of-128 batch to exercise the zero-pad fast path with
    # a multi-block grid (rows=40, br=16, grid=3; partial last block).
    B3 = 5120
    x3 = jax.random.normal(k_x3, (B3, 1), dtype=jnp.float32)
    out3 = jax.block_until_ready(simple_classifier(x3, w1, b1, w2, b2))
    ref3 = _ref_forward(x3, w1, b1, w2, b2)
    assert out3.shape == (B3, 1)
    assert jnp.allclose(out3, ref3, atol=2e-3, rtol=2e-3)

    print("KERNEL_OK")
</pallas_src>

<mosaic_0001>
module attributes {stable_mosaic.version = 11 : i64} {
  func.func @_mlp_kernel(%arg0: i32, %arg1: memref<1x128xf32, #tpu.memory_space<vmem>>, %arg2: memref<10xf32, #tpu.memory_space<smem>>, %arg3: memref<10xf32, #tpu.memory_space<smem>>, %arg4: memref<10xf32, #tpu.memory_space<smem>>, %arg5: memref<1xf32, #tpu.memory_space<smem>>, %arg6: memref<1x128xf32, #tpu.memory_space<vmem>>) attributes {dimension_semantics = [#tpu.dimension_semantics<parallel>], iteration_bounds = array<i64: 1>, scalar_prefetch = 0 : i64, scratch_operands = 0 : i64, tpu.core_type = #tpu.core_type<tc>, window_params = [{transform_indices = @transform_0, window_bounds = array<i64: 1, 128>}, {transform_indices = @transform_1, window_bounds = array<i64: 10>}, {transform_indices = @transform_2, window_bounds = array<i64: 10>}, {transform_indices = @transform_3, window_bounds = array<i64: 10>}, {transform_indices = @transform_4, window_bounds = array<i64: 1>}, {transform_indices = @transform_5, window_bounds = array<i64: 1, 128>}]} {
    %c0 = arith.constant 0 : index
    %c0_0 = arith.constant 0 : index
    %0 = vector.load %arg1[%c0, %c0_0] : memref<1x128xf32, #tpu.memory_space<vmem>>, vector<1x128xf32>
    %c0_1 = arith.constant 0 : index
    %1 = memref.load %arg5[%c0_1] : memref<1xf32, #tpu.memory_space<smem>>
    %cst = arith.constant 0.000000e+00 : f32
    %2 = arith.subf %cst, %1 : f32
    %3 = vector.broadcast %2 : f32 to vector<1x128xf32>
    %c0_2 = arith.constant 0 : index
    %4 = memref.load %arg2[%c0_2] : memref<10xf32, #tpu.memory_space<smem>>
    %c0_3 = arith.constant 0 : index
    %5 = memref.load %arg3[%c0_3] : memref<10xf32, #tpu.memory_space<smem>>
    %6 = vector.broadcast %4 : f32 to vector<1x128xf32>
    %7 = arith.mulf %0, %6 : vector<1x128xf32>
    %8 = vector.broadcast %5 : f32 to vector<1x128xf32>
    %9 = arith.addf %7, %8 : vector<1x128xf32>
    %cst_4 = arith.constant 0.000000e+00 : f32
    %10 = vector.broadcast %cst_4 : f32 to vector<1x128xf32>
    %11 = arith.maximumf %9, %10 : vector<1x128xf32>
    %c0_5 = arith.constant 0 : index
    %12 = memref.load %arg4[%c0_5] : memref<10xf32, #tpu.memory_space<smem>>
    %13 = vector.broadcast %12 : f32 to vector<1x128xf32>
    %14 = arith.mulf %11, %13 : vector<1x128xf32>
    %15 = arith.subf %3, %14 : vector<1x128xf32>
    %c1 = arith.constant 1 : index
    %16 = memref.load %arg2[%c1] : memref<10xf32, #tpu.memory_space<smem>>
    %c1_6 = arith.constant 1 : index
    %17 = memref.load %arg3[%c1_6] : memref<10xf32, #tpu.memory_space<smem>>
    %18 = vector.broadcast %16 : f32 to vector<1x128xf32>
    %19 = arith.mulf %0, %18 : vector<1x128xf32>
    %20 = vector.broadcast %17 : f32 to vector<1x128xf32>
    %21 = arith.addf %19, %20 : vector<1x128xf32>
    %cst_7 = arith.constant 0.000000e+00 : f32
    %22 = vector.broadcast %cst_7 : f32 to vector<1x128xf32>
    %23 = arith.maximumf %21, %22 : vector<1x128xf32>
    %c1_8 = arith.constant 1 : index
    %24 = memref.load %arg4[%c1_8] : memref<10xf32, #tpu.memory_space<smem>>
    %25 = vector.broadcast %24 : f32 to vector<1x128xf32>
    %26 = arith.mulf %23, %25 : vector<1x128xf32>
    %27 = arith.subf %15, %26 : vector<1x128xf32>
    %c2 = arith.constant 2 : index
    %28 = memref.load %arg2[%c2] : memref<10xf32, #tpu.memory_space<smem>>
    %c2_9 = arith.constant 2 : index
    %29 = memref.load %arg3[%c2_9] : memref<10xf32, #tpu.memory_space<smem>>
    %30 = vector.broadcast %28 : f32 to vector<1x128xf32>
    %31 = arith.mulf %0, %30 : vector<1x128xf32>
    %32 = vector.broadcast %29 : f32 to vector<1x128xf32>
    %33 = arith.addf %31, %32 : vector<1x128xf32>
    %cst_10 = arith.constant 0.000000e+00 : f32
    %34 = vector.broadcast %cst_10 : f32 to vector<1x128xf32>
    %35 = arith.maximumf %33, %34 : vector<1x128xf32>
    %c2_11 = arith.constant 2 : index
    %36 = memref.load %arg4[%c2_11] : memref<10xf32, #tpu.memory_space<smem>>
    %37 = vector.broadcast %36 : f32 to vector<1x128xf32>
    %38 = arith.mulf %35, %37 : vector<1x128xf32>
    %39 = arith.subf %27, %38 : vector<1x128xf32>
    %c3 = arith.constant 3 : index
    %40 = memref.load %arg2[%c3] : memref<10xf32, #tpu.memory_space<smem>>
    %c3_12 = arith.constant 3 : index
    %41 = memref.load %arg3[%c3_12] : memref<10xf32, #tpu.memory_space<smem>>
    %42 = vector.broadcast %40 : f32 to vector<1x128xf32>
    %43 = arith.mulf %0, %42 : vector<1x128xf32>
    %44 = vector.broadcast %41 : f32 to vector<1x128xf32>
    %45 = arith.addf %43, %44 : vector<1x128xf32>
    %cst_13 = arith.constant 0.000000e+00 : f32
    %46 = vector.broadcast %cst_13 : f32 to vector<1x128xf32>
    %47 = arith.maximumf %45, %46 : vector<1x128xf32>
    %c3_14 = arith.constant 3 : index
    %48 = memref.load %arg4[%c3_14] : memref<10xf32, #tpu.memory_space<smem>>
    %49 = vector.broadcast %48 : f32 to vector<1x128xf32>
    %50 = arith.mulf %47, %49 : vector<1x128xf32>
    %51 = arith.subf %39, %50 : vector<1x128xf32>
    %c4 = arith.constant 4 : index
    %52 = memref.load %arg2[%c4] : memref<10xf32, #tpu.memory_space<smem>>
    %c4_15 = arith.constant 4 : index
    %53 = memref.load %arg3[%c4_15] : memref<10xf32, #tpu.memory_space<smem>>
    %54 = vector.broadcast %52 : f32 to vector<1x128xf32>
    %55 = arith.mulf %0, %54 : vector<1x128xf32>
    %56 = vector.broadcast %53 : f32 to vector<1x128xf32>
    %57 = arith.addf %55, %56 : vector<1x128xf32>
    %cst_16 = arith.constant 0.000000e+00 : f32
    %58 = vector.broadcast %cst_16 : f32 to vector<1x128xf32>
    %59 = arith.maximumf %57, %58 : vector<1x128xf32>
    %c4_17 = arith.constant 4 : index
    %60 = memref.load %arg4[%c4_17] : memref<10xf32, #tpu.memory_space<smem>>
    %61 = vector.broadcast %60 : f32 to vector<1x128xf32>
    %62 = arith.mulf %59, %61 : vector<1x128xf32>
    %63 = arith.subf %51, %62 : vector<1x128xf32>
    %c5 = arith.constant 5 : index
    %64 = memref.load %arg2[%c5] : memref<10xf32, #tpu.memory_space<smem>>
    %c5_18 = arith.constant 5 : index
    %65 = memref.load %arg3[%c5_18] : memref<10xf32, #tpu.memory_space<smem>>
    %66 = vector.broadcast %64 : f32 to vector<1x128xf32>
    %67 = arith.mulf %0, %66 : vector<1x128xf32>
    %68 = vector.broadcast %65 : f32 to vector<1x128xf32>
    %69 = arith.addf %67, %68 : vector<1x128xf32>
    %cst_19 = arith.constant 0.000000e+00 : f32
    %70 = vector.broadcast %cst_19 : f32 to vector<1x128xf32>
    %71 = arith.maximumf %69, %70 : vector<1x128xf32>
    %c5_20 = arith.constant 5 : index
    %72 = memref.load %arg4[%c5_20] : memref<10xf32, #tpu.memory_space<smem>>
    %73 = vector.broadcast %72 : f32 to vector<1x128xf32>
    %74 = arith.mulf %71, %73 : vector<1x128xf32>
    %75 = arith.subf %63, %74 : vector<1x128xf32>
    %c6 = arith.constant 6 : index
    %76 = memref.load %arg2[%c6] : memref<10xf32, #tpu.memory_space<smem>>
    %c6_21 = arith.constant 6 : index
    %77 = memref.load %arg3[%c6_21] : memref<10xf32, #tpu.memory_space<smem>>
    %78 = vector.broadcast %76 : f32 to vector<1x128xf32>
    %79 = arith.mulf %0, %78 : vector<1x128xf32>
    %80 = vector.broadcast %77 : f32 to vector<1x128xf32>
    %81 = arith.addf %79, %80 : vector<1x128xf32>
    %cst_22 = arith.constant 0.000000e+00 : f32
    %82 = vector.broadcast %cst_22 : f32 to vector<1x128xf32>
    %83 = arith.maximumf %81, %82 : vector<1x128xf32>
    %c6_23 = arith.constant 6 : index
    %84 = memref.load %arg4[%c6_23] : memref<10xf32, #tpu.memory_space<smem>>
    %85 = vector.broadcast %84 : f32 to vector<1x128xf32>
    %86 = arith.mulf %83, %85 : vector<1x128xf32>
    %87 = arith.subf %75, %86 : vector<1x128xf32>
    %c7 = arith.constant 7 : index
    %88 = memref.load %arg2[%c7] : memref<10xf32, #tpu.memory_space<smem>>
    %c7_24 = arith.constant 7 : index
    %89 = memref.load %arg3[%c7_24] : memref<10xf32, #tpu.memory_space<smem>>
    %90 = vector.broadcast %88 : f32 to vector<1x128xf32>
    %91 = arith.mulf %0, %90 : vector<1x128xf32>
    %92 = vector.broadcast %89 : f32 to vector<1x128xf32>
    %93 = arith.addf %91, %92 : vector<1x128xf32>
    %cst_25 = arith.constant 0.000000e+00 : f32
    %94 = vector.broadcast %cst_25 : f32 to vector<1x128xf32>
    %95 = arith.maximumf %93, %94 : vector<1x128xf32>
    %c7_26 = arith.constant 7 : index
    %96 = memref.load %arg4[%c7_26] : memref<10xf32, #tpu.memory_space<smem>>
    %97 = vector.broadcast %96 : f32 to vector<1x128xf32>
    %98 = arith.mulf %95, %97 : vector<1x128xf32>
    %99 = arith.subf %87, %98 : vector<1x128xf32>
    %c8 = arith.constant 8 : index
    %100 = memref.load %arg2[%c8] : memref<10xf32, #tpu.memory_space<smem>>
    %c8_27 = arith.constant 8 : index
    %101 = memref.load %arg3[%c8_27] : memref<10xf32, #tpu.memory_space<smem>>
    %102 = vector.broadcast %100 : f32 to vector<1x128xf32>
    %103 = arith.mulf %0, %102 : vector<1x128xf32>
    %104 = vector.broadcast %101 : f32 to vector<1x128xf32>
    %105 = arith.addf %103, %104 : vector<1x128xf32>
    %cst_28 = arith.constant 0.000000e+00 : f32
    %106 = vector.broadcast %cst_28 : f32 to vector<1x128xf32>
    %107 = arith.maximumf %105, %106 : vector<1x128xf32>
    %c8_29 = arith.constant 8 : index
    %108 = memref.load %arg4[%c8_29] : memref<10xf32, #tpu.memory_space<smem>>
    %109 = vector.broadcast %108 : f32 to vector<1x128xf32>
    %110 = arith.mulf %107, %109 : vector<1x128xf32>
    %111 = arith.subf %99, %110 : vector<1x128xf32>
    %c9 = arith.constant 9 : index
    %112 = memref.load %arg2[%c9] : memref<10xf32, #tpu.memory_space<smem>>
    %c9_30 = arith.constant 9 : index
    %113 = memref.load %arg3[%c9_30] : memref<10xf32, #tpu.memory_space<smem>>
    %114 = vector.broadcast %112 : f32 to vector<1x128xf32>
    %115 = arith.mulf %0, %114 : vector<1x128xf32>
    %116 = vector.broadcast %113 : f32 to vector<1x128xf32>
    %117 = arith.addf %115, %116 : vector<1x128xf32>
    %cst_31 = arith.constant 0.000000e+00 : f32
    %118 = vector.broadcast %cst_31 : f32 to vector<1x128xf32>
    %119 = arith.maximumf %117, %118 : vector<1x128xf32>
    %c9_32 = arith.constant 9 : index
    %120 = memref.load %arg4[%c9_32] : memref<10xf32, #tpu.memory_space<smem>>
    %121 = vector.broadcast %120 : f32 to vector<1x128xf32>
    %122 = arith.mulf %119, %121 : vector<1x128xf32>
    %123 = arith.subf %111, %122 : vector<1x128xf32>
    %cst_33 = arith.constant 3.000000e+01 : f32
    %124 = vector.broadcast %cst_33 : f32 to vector<1x128xf32>
    %125 = arith.minimumf %123, %124 : vector<1x128xf32>
    %126 = math.exp %125 : vector<1x128xf32>
    %cst_34 = arith.constant 1.000000e+00 : f32
    %127 = vector.broadcast %cst_34 : f32 to vector<1x128xf32>
    %128 = arith.addf %127, %126 : vector<1x128xf32>
    %129 = tpu.reciprocal %128 {approx = true} : vector<1x128xf32> -> vector<1x128xf32>
    %c0_35 = arith.constant 0 : index
    %c0_36 = arith.constant 0 : index
    %130 = vector.load %arg6[%c0_35, %c0_36] : memref<1x128xf32, #tpu.memory_space<vmem>>, vector<1x128xf32>
    tpu.vector_store %arg6[%c0_35, %c0_36], %129 {strides = array<i32>} : memref<1x128xf32, #tpu.memory_space<vmem>>, vector<1x128xf32>,
    return
  }
  func.func @transform_0(%arg0: i32) -> (i32, i32) {
    %c0_i32 = arith.constant 0 : i32
    %c0_i32_0 = arith.constant 0 : i32
    return %arg0, %c0_i32 : i32, i32
  }
  func.func @transform_1(%arg0: i32) -> i32 {
    %c0_i32 = arith.constant 0 : i32
    %c0_i32_0 = arith.constant 0 : i32
    return %c0_i32 : i32
  }
  func.func @transform_2(%arg0: i32) -> i32 {
    %c0_i32 = arith.constant 0 : i32
    %c0_i32_0 = arith.constant 0 : i32
    return %c0_i32 : i32
  }
  func.func @transform_3(%arg0: i32) -> i32 {
    %c0_i32 = arith.constant 0 : i32
    %c0_i32_0 = arith.constant 0 : i32
    return %c0_i32 : i32
  }
  func.func @transform_4(%arg0: i32) -> i32 {
    %c0_i32 = arith.constant 0 : i32
    %c0_i32_0 = arith.constant 0 : i32
    return %c0_i32 : i32
  }
  func.func @transform_5(%arg0: i32) -> (i32, i32) {
    %c0_i32 = arith.constant 0 : i32
    %c0_i32_0 = arith.constant 0 : i32
    return %arg0, %c0_i32 : i32, i32
  }
}

</mosaic_0001>

<bundles_post_ra>
// kernel: tpu_custom_call.1
= control target key start
LH: loop header
LB: loop body
LE: loop exit
PB: predicated region body
PF: predicated region fallthrough
CT: control target
= control target key end

     0   :  { %11 = vsyncpa [#allocation5], 0  ;;  %s441_s0 = inlined_call_operand.vmem [shape: f32[1,128], index: 0, kind: input, shape index: {}]   ;;  %s442_s1 = inlined_call_operand.vmem [shape: f32[10], index: 1, kind: input, shape index: {}]   ;;  %s443_s2 = inlined_call_operand.vmem [shape: f32[10], index: 2, kind: input, shape index: {}]   ;;  %s444_s3 = inlined_call_operand.vmem [shape: f32[10], index: 3, kind: input, shape index: {}]   ;;  %s445_s4 = inlined_call_operand.<no memory space> [shape: f32[1], index: 4, kind: input, shape index: {}]   ;;  %s446_s5 = inlined_call_operand.hbm [shape: f32[1,128], index: 5, kind: output, shape index: {}]  }
   0x1   :  { %12 = vsyncpa [#allocation7], 0  ;;  %s32_s20 = sshll.u32 %s443_s2, 4  ;;  %s33_s20 = int_to_ptr.vmem [resolvable:$true] %s32_s20 }
   0x2   :  { %13 = vsyncpa [#allocation4], 0  ;;  %s22_s23 = sshll.u32 %s442_s1, 4  ;;  %s229_s24 = scalar_lea.vmem %s33_s20, 16  ;;  %s23_s23 = int_to_ptr.vmem [resolvable:$true] %s22_s23 }
   0x3   :  { %p230_p0 = scmp.ne.s32.totalorder %s33_s20, %s229_s24  ;;  %p234_p1 = scmp.lt.s32.totalorder %s33_s20, %s33_s20 }
   0x4   :  { %p235_p2 = scmp.lt.s32.totalorder %s229_s24, %s229_s24 }
   0x6   :  { %p236_p3 = por %p235_p2, %p234_p1 }
   0x8   :  { %p237_p4 = pnand %p236_p3, %p230_p0 }
   0xa   :  { %240 = shalt.err (!%p237_p4)
}
   0xb   :  { %s293_s25 = smov [#allocation6]   ;;  %s241_s26 = scalar_lea.vmem %s23_s23, 16 }
   0xc   :  { %35 = dma.vmem_to_smem %s33_s20, 16, %s293_s25, [#allocation7]  }
   0xd   :  { %p242_p5 = scmp.ne.s32.totalorder %s23_s23, %s241_s26  ;;  %p246_p6 = scmp.lt.s32.totalorder %s23_s23, %s23_s23 }
   0xe   :  { %p247_p7 = scmp.lt.s32.totalorder %s241_s26, %s241_s26 }
  0x10   :  { %p248_p8 = por %p247_p7, %p246_p6 }
  0x12   :  { %p249_p9 = pnand %p248_p8, %p242_p5 }
  0x14   :  { %252 = shalt.err (!%p249_p9)
}
  0x15   :  { %s294_s2 = smov [#allocation3]   ;;  %s42_s28 = sshll.u32 %s444_s3, 4  ;;  %s43_s28 = int_to_ptr.vmem [resolvable:$true] %s42_s28 }
  0x16   :  { %25 = dma.vmem_to_smem %s23_s23, 16, %s294_s2, [#allocation5]  }
  0x17   :  { %s253_s29 = scalar_lea.vmem %s43_s28, 16  ;;  %p258_p11 = scmp.lt.s32.totalorder %s43_s28, %s43_s28 }
  0x18   :  { %p254_p10 = scmp.ne.s32.totalorder %s43_s28, %s253_s29  ;;  %p259_p12 = scmp.lt.s32.totalorder %s253_s29, %s253_s29 }
  0x1a   :  { %p260_p13 = por %p259_p12, %p258_p11 }
  0x1c   :  { %p261_p0 = pnand %p260_p13, %p254_p10 }
  0x1e   :  { %264 = shalt.err (!%p261_p0)
}
  0x1f   :  { %s295_s30 = smov [#allocation8]  }
  0x20   :  { %45 = dma.vmem_to_smem %s43_s28, 16, %s295_s30, [#allocation7]  }
  0x21   :  { %287 = dma.done.wait [#allocation5], 16  }
  0x22   :  { %288 = vsyncadd [#allocation5], 4294967280 }
  0x23   :  { %289 = dma.done.wait [#allocation7], 32  }
  0x24   :  { %290 = vsyncadd [#allocation7], 4294967264 }
  0x25   :  { %57 = sfence }
  0x26   :  { %s60_s8 = ssub.f32 0.0, %s445_s4  ;;  %s62_s3 = sld [smem:[#allocation3]]  ;;  %v348_v0 = vld [vmem:[%s441_s0] sm:$0x1] }
  0x27   :  { %s63_s9 = sld [smem:[#allocation6]]  ;;  %s194_s11 = sld [smem:[#allocation3 + $0x1]] }
  0x28   :  { %s339_s10 = sld [smem:[#allocation8]]  ;;  %s341_s12 = sld [smem:[#allocation6 + $0x1]]  ;;  %v61_v6 = vstv %s60_s8 }
  0x29   :  { %s343_s13 = sld [smem:[#allocation8 + $0x1]]  ;;  %s197_s14 = sld [smem:[#allocation3 + $0x2]] }
  0x2a   :  { %s350_s17 = sld [smem:[#allocation6 + $0x2]]  ;;  %s354_s4 = sld [smem:[#allocation3 + $0x3]] }
  0x2b   :  { %s352_s18 = sld [smem:[#allocation8 + $0x2]]  ;;  %s356_s19 = sld [smem:[#allocation6 + $0x3]] }
  0x2c   :  { %v64_v1 = vstv %s62_s3  ;;  %s358_s20 = sld [smem:[#allocation8 + $0x3]]  ;;  %s360_s21 = sld [smem:[#allocation3 + $0x4]] }
  0x2d   :  { %v65_v2 = vmul.f32 %v64_v1, %v348_v0  ;;  %v66_v3 = vstv %s63_s9  ;;  %s363_s0 = sld [smem:[#allocation6 + $0x4]]  ;;  %v75_v4 = vstv %s194_s11  ;;  %s368_s23 = sld [smem:[#allocation3 + $0x5]] }
  0x2e   :  { %s365_s22 = sld [smem:[#allocation8 + $0x4]]  ;;  %v77_v5 = vstv %s341_s12  ;;  %s370_s24 = sld [smem:[#allocation6 + $0x5]]  ;;  %v76_v8 = vmul.f32 %v75_v4, %v348_v0  ;;  %v70_v10 = vstv %s339_s10 }
  0x2f   :  { %v67_v7 = vadd.f32 %v66_v3, %v65_v2  ;;  %v86_v9 = vstv %s197_s14  ;;  %s373_s25 = sld [smem:[#allocation3 + $0x6]]  ;;  %v81_v11 = vstv %s343_s13  ;;  %s379_s26 = sld [smem:[#allocation8 + $0x5]] }
  0x30   :  { %v87_v12 = vmul.f32 %v86_v9, %v348_v0  ;;  %v88_v13 = vstv %s350_s17  ;;  %s381_s2 = sld [smem:[#allocation6 + $0x6]]  ;;  %v78_v15 = vadd.f32 %v77_v5, %v76_v8  ;;  %v97_v16 = vstv %s354_s4  ;;  %s385_s1 = sld [smem:[#allocation3 + $0x7]] }
  0x31   :  { %v68_v14 = vmax.f32 %v67_v7, 0.0  ;;  %v99_v17 = vstv %s356_s19  ;;  %v92_v19 = vstv %s352_s18  ;;  %v98_v20 = vmul.f32 %v97_v16, %v348_v0  ;;  %s390_s27 = sld [smem:[#allocation8 + $0x6]]  ;;  %s392_s28 = sld [smem:[#allocation6 + $0x7]] }
  0x32   :  { %v89_v18 = vadd.f32 %v88_v13, %v87_v12  ;;  %v108_v21 = vstv %s360_s21  ;;  %v79_v23 = vmax.f32 %v78_v15, 0.0  ;;  %s396_s29 = sld [smem:[#allocation3 + $0x8]]  ;;  %v103_v28 = vstv %s358_s20  ;;  %s402_s6 = sld [smem:[#allocation8 + $0x7]] }
  0x33   :  { %v71_v22 = vmul.f32 %v70_v10, %v68_v14  ;;  %v109_v24 = vmul.f32 %v108_v21, %v348_v0  ;;  %v110_v25 = vstv %s363_s0  ;;  %s398_s30 = sld [smem:[#allocation6 + $0x8]]  ;;  %v100_v27 = vadd.f32 %v99_v17, %v98_v20  ;;  %s405_s7 = sld [smem:[#allocation3 + $0x9]] }
  0x34   :  { %v90_v26 = vmax.f32 %v89_v18, 0.0  ;;  %v119_v29 = vstv %s368_s23  ;;  %v82_v31 = vmul.f32 %v81_v11, %v79_v23  ;;  %s407_s8 = sld [smem:[#allocation6 + $0x9]]  ;;  %v114_v36 = vstv %s365_s22  ;;  %s412_s3 = sld [smem:[#allocation8 + $0x8]] }
  0x35   :  { %v72_v30 = vsub.f32 %v61_v6, %v71_v22  ;;  %v111_v32 = vadd.f32 %v110_v25, %v109_v24  ;;  %v120_v33 = vmul.f32 %v119_v29, %v348_v0  ;;  %v101_v35 = vmax.f32 %v100_v27, 0.0  ;;  %s220_s9 = sld [smem:[#allocation8 + $0x9]]  ;;  %s296_s10 = smov [#allocation9]  }
  0x36   :  { %v93_v34 = vmul.f32 %v92_v19, %v90_v26  ;;  %v121_v37 = vstv %s370_s24  ;;  %v130_v41 = vstv %s373_s25  ;;  %v125_v43 = vstv %s379_s26  ;;  %s184_s11 = sshll.u32 %s296_s10, 4  ;;  %s185_s11 = int_to_ptr.vmem [resolvable:$true] %s184_s11 }
  0x37   :  { %v83_v38 = vsub.f32 %v72_v30, %v82_v31  ;;  %v112_v39 = vmax.f32 %v111_v32, 0.0  ;;  %v122_v40 = vadd.f32 %v121_v37, %v120_v33  ;;  %v104_v42 = vmul.f32 %v103_v28, %v101_v35  ;;  %s265_s12 = scalar_lea.vmem %s185_s11, 16  ;;  %s269_s13 = scalar_lea.vmem %s185_s11, 32 }
  0x38   :  { %v131_v44 = vmul.f32 %v130_v41, %v348_v0  ;;  %v132_v45 = vstv %s381_s2  ;;  %v141_v49 = vstv %s385_s1  ;;  %v136_v51 = vstv %s390_s27  ;;  %p266_p1 = scmp.ne.s32.totalorder %s185_s11, %s265_s12  ;;  %p270_p2 = scmp.lt.s32.totalorder %s185_s11, %s185_s11 }
  0x39   :  { %v94_v46 = vsub.f32 %v83_v38, %v93_v34  ;;  %v115_v47 = vmul.f32 %v114_v36, %v112_v39  ;;  %v123_v48 = vmax.f32 %v122_v40, 0.0  ;;  %v142_v52 = vmul.f32 %v141_v49, %v348_v0  ;;  %p271_p3 = scmp.lt.s32.totalorder %s269_s13, %s265_s12 }
  0x3a   :  { %v133_v50 = vadd.f32 %v132_v45, %v131_v44  ;;  %v143_v53 = vstv %s392_s28  ;;  %v152_v56 = vstv %s396_s29  ;;  %v154_v57 = vstv %s398_s30 }
  0x3b   :  { %v105_v54 = vsub.f32 %v94_v46, %v104_v42  ;;  %v126_v55 = vmul.f32 %v125_v43, %v123_v48  ;;  %v144_v59 = vadd.f32 %v143_v53, %v142_v52  ;;  %v153_v60 = vmul.f32 %v152_v56, %v348_v0  ;;  %p272_p4 = por %p271_p3, %p270_p2 }
  0x3c   :  { %v134_v58 = vmax.f32 %v133_v50, 0.0  ;;  %v147_v62 = vstv %s402_s6  ;;  %v163_v63 = vstv %s405_s7  ;;  %v165_v1 = vstv %s407_s8 }
  0x3d   :  { %v116_v61 = vsub.f32 %v105_v54, %v115_v47  ;;  %v145_v3 = vmax.f32 %v144_v59, 0.0  ;;  %v155_v4 = vadd.f32 %v154_v57, %v153_v60  ;;  %v164_v5 = vmul.f32 %v163_v63, %v348_v0  ;;  %p273_p5 = pnand %p272_p4, %p266_p1 }
  0x3e   :  { %v137_v2 = vmul.f32 %v136_v51, %v134_v58  ;;  %v158_v7 = vstv %s412_s3  ;;  %v169_v12 = vstv %s220_s9 }
  0x3f   :  { %v127_v6 = vsub.f32 %v116_v61, %v126_v55  ;;  %v148_v8 = vmul.f32 %v147_v62, %v145_v3  ;;  %v156_v9 = vmax.f32 %v155_v4, 0.0  ;;  %v166_v10 = vadd.f32 %v165_v1, %v164_v5 }
  0x41   :  { %v138_v11 = vsub.f32 %v127_v6, %v137_v2  ;;  %v159_v13 = vmul.f32 %v158_v7, %v156_v9  ;;  %v167_v14 = vmax.f32 %v166_v10, 0.0 }
  0x43   :  { %v149_v15 = vsub.f32 %v138_v11, %v148_v8  ;;  %v170_v16 = vmul.f32 %v169_v12, %v167_v14 }
  0x45   :  { %v160_v17 = vsub.f32 %v149_v15, %v159_v13 }
  0x47   :  { %v171_v18 = vsub.f32 %v160_v17, %v170_v16 }
  0x49   :  { %v172_v19 = vmin.f32 %v171_v18, 30.0 }
  0x4b   :  { %v173_v20 = vmul.f32 1.442695, %v172_v19 }
  0x4d   :  { %225 = vpow2.f32 %v173_v20 }
  0x57   :  { %v226_v21 = vpop.eup %225 }
  0x58   :  { %v175_v22 = vadd.f32 1.0, %v226_v21 }
  0x5a   :  { %227 = vrcp.f32 %v175_v22 }
  0x64   :  { %v228_v0 = vpop.eup %227 }
  0x65   :  { %177 = vst [vmem:[#allocation9] sm:$0x1] %v228_v0 }
  0x66   :  { %276 = shalt.err (!%p273_p5)
}
  0x67   :  { %s277_s16 = scalar_lea.hbm %s446_s5, 16 }
  0x68   :  { %p278_p6 = scmp.ne.s32.totalorder %s446_s5, %s277_s16  ;;  %p281_p7 = scmp.lt.u32.totalorder %s277_s16, %s446_s5 }
  0x6a   :  { %p283_p8 = pnand %p281_p7, %p278_p6 }
  0x6c   :  { %286 = shalt.err (!%p283_p8)
}
  0x6d   :  { %187 = dma.vmem_to_hbm [thread:$0]  %s185_s11, 16, %s446_s5, [#allocation4]  }
  0x6e   :  { %291 = dma.done.wait [#allocation4], 16  }
  0x6f   :  { %292 = vsyncadd [#allocation4], 4294967280 }
  0x70   :  { %191 = vsyncpa [#allocation4], 1 }
  0x71   :  { %192 = vsyncpa [#allocation5], 1 }
  0x72   :  { %193 = vsyncpa [#allocation7], 1 }

</bundles_post_ra>
